<compile_context>
chip_gen: v7x
topology: tpu7x:2x2x1
jax: 0.10.0
libtpu: 0.0.40
codegen_flags: <defaults>
</compile_context>

<pallas_src>
import math

import jax
import jax.numpy as jnp
from jax.experimental import pallas as pl
from jax.experimental.pallas import tpu as pltpu


def _round_up(a, b):
    return ((a + b - 1) // b) * b


# ---------------------------------------------------------------------------
# Kernels
# ---------------------------------------------------------------------------
def _mlp_kernel_resident(x_ref, wh_ref, bh_ref, wheads_ref, bheads_ref,
                         heads_ref, hidden_ref):
    """Grid = (batch tiles,).  Whole wh is VMEM-resident: one dot per tile."""
    x_bf = x_ref[...].astype(jnp.bfloat16)
    h = jnp.maximum(
        jnp.dot(x_bf, wh_ref[...], preferred_element_type=jnp.float32)
        + bh_ref[...], 0.0)                                       # [bm, Hd] f32
    hidden_ref[...] = h.astype(hidden_ref.dtype)
    heads = jnp.dot(h.astype(jnp.bfloat16), wheads_ref[...],
                    preferred_element_type=jnp.float32) + bheads_ref[...]
    heads_ref[...] = heads.astype(heads_ref.dtype)


def _mlp_kernel_streamed(x_ref, wh_ref, bh_ref, wheads_ref, bheads_ref,
                         heads_ref, hidden_ref):
    """Grid = (batch tiles, F reduction tiles).

    Accumulates directly into hidden_ref (its block index is (i, 0), so the
    block stays VMEM-resident across the k axis) -> no f32 scratch buffer.
    """
    k = pl.program_id(1)
    partial = jnp.dot(x_ref[...].astype(jnp.bfloat16), wh_ref[...],
                      preferred_element_type=jnp.float32)

    @pl.when(k == 0)
    def _():
        hidden_ref[...] = partial          # assign, not zero-init + add

    @pl.when(k > 0)
    def _():
        hidden_ref[...] += partial

    @pl.when(k == pl.num_programs(1) - 1)
    def _():
        h = jnp.maximum(hidden_ref[...] + bh_ref[...], 0.0)
        hidden_ref[...] = h
        heads = jnp.dot(h.astype(jnp.bfloat16), wheads_ref[...],
                        preferred_element_type=jnp.float32) + bheads_ref[...]
        heads_ref[...] = heads.astype(heads_ref.dtype)


# ---------------------------------------------------------------------------
# One-time weight packing (hoisted out of the per-call forward)
# ---------------------------------------------------------------------------
def prepare_packed_params(params):
    """Pack / pad / cast weights ONCE; pass the result to every forward call."""
    wh, bh = params["wh"], params["bh"]
    wo, bo = params["wo"], params["bo"]
    ws, bs = params["ws"], params["bs"]

    F, Hd = wh.shape
    C = wo.shape[1]
    Fp = _round_up(F, 128)
    Hd_p = _round_up(Hd, 128)
    C_pad = _round_up(C, 128)
    Nh = C_pad + Hd_p

    wh_p = jnp.zeros((Fp, Hd_p), jnp.bfloat16).at[:F, :Hd].set(
        wh.astype(jnp.bfloat16))
    bh_p = jnp.zeros((1, Hd_p), jnp.float32).at[:, :Hd].set(bh.reshape(1, Hd))

    # Fused, lane-dense head weights: [Hd_p, C_pad | Hd_p]
    w_heads = jnp.zeros((Hd_p, Nh), jnp.bfloat16)
    w_heads = w_heads.at[:Hd, :C].set(wo.astype(jnp.bfloat16))
    w_heads = w_heads.at[:Hd, C_pad:C_pad + Hd].set(ws.astype(jnp.bfloat16))
    b_heads = jnp.zeros((1, Nh), jnp.float32)
    b_heads = b_heads.at[:, :C].set(bo.reshape(1, C))
    b_heads = b_heads.at[:, C_pad:C_pad + Hd].set(bs.reshape(1, Hd))

    return dict(wh=wh_p, bh=bh_p, w_heads=w_heads, b_heads=b_heads,
                F=F, Fp=Fp, Hd=Hd, Hd_p=Hd_p, C=C, C_pad=C_pad, Nh=Nh)


# ---------------------------------------------------------------------------
# Forward wrapper
# ---------------------------------------------------------------------------
_RESIDENT_WH_BYTES = 8 * 1024 * 1024   # resident-wh cap (safe on v7x 64 MiB VMEM)
_RESIDENT_X_BYTES = 12 * 1024 * 1024   # cap on double-buffered x tile


def _pick_bm(B):
    if B <= 8:
        return 8
    if B < 128:
        return _round_up(B, 16)          # bf16 sublane packing prefers 16
    if B < 512:
        return 128                       # keep >= 2 batch tiles (v7x megacore)
    if B < 1024:
        return 256                       # fill MXU M on v6e/v7x, still >= 2 tiles
    return 512


def self_modeling_mlp_forward(x_nchw, packed, *, tk_max=1024):
    """x_nchw: [B, ...] float32.  packed: output of prepare_packed_params.

    Returns (logits [B, num_classes], self_pred [B, Hd], hidden [B, Hd]), f32.
    """
    B = x_nchw.shape[0]
    x = x_nchw.reshape(B, -1)                     # flatten like x.view(B, -1)
    F, Fp = packed["F"], packed["Fp"]
    Hd, Hd_p = packed["Hd"], packed["Hd_p"]
    C, C_pad, Nh = packed["C"], packed["C_pad"], packed["Nh"]
    assert x.shape[1] == F

    bm = _pick_bm(B)
    Bp = _round_up(B, bm)

    # Only materialize a padded copy of x when padding is actually required.
    if Bp != B or Fp != F:
        x_in = jnp.zeros((Bp, Fp), x.dtype).at[:B, :F].set(x)
    else:
        x_in = x
    xbytes = x_in.dtype.itemsize

    wh_bytes = Fp * Hd_p * 2
    resident = (wh_bytes <= _RESIDENT_WH_BYTES
                and bm * Fp * xbytes * 2 <= _RESIDENT_X_BYTES)

    out_shapes = (
        jax.ShapeDtypeStruct((Bp, Nh), jnp.float32),     # fused heads slab
        jax.ShapeDtypeStruct((Bp, Hd_p), jnp.float32),   # hidden activations
    )
    out_bytes = (Bp * Nh + Bp * Hd_p) * 4
    n_btiles = Bp // bm

    if resident:
        grid = (n_btiles,)
        kernel = _mlp_kernel_resident
        in_specs = [
            pl.BlockSpec((bm, Fp), lambda i: (i, 0)),        # x tile (f32)
            pl.BlockSpec((Fp, Hd_p), lambda i: (0, 0)),      # wh, resident
            pl.BlockSpec((1, Hd_p), lambda i: (0, 0)),       # bh
            pl.BlockSpec((Hd_p, Nh), lambda i: (0, 0)),      # fused head W
            pl.BlockSpec((1, Nh), lambda i: (0, 0)),         # fused head b
        ]
        out_specs = (
            pl.BlockSpec((bm, Nh), lambda i: (i, 0)),
            pl.BlockSpec((bm, Hd_p), lambda i: (i, 0)),
        )
        dims = ("parallel",)
        wh_reads = 1                      # constant index map -> fetched once
    else:
        tk = 128
        for cand in (tk_max, 512, 256, 128):
            if cand <= Fp and Fp % cand == 0:
                tk = cand
                break
        grid = (n_btiles, Fp // tk)
        kernel = _mlp_kernel_streamed
        in_specs = [
            pl.BlockSpec((bm, tk), lambda i, k: (i, k)),     # x tile (f32)
            pl.BlockSpec((tk, Hd_p), lambda i, k: (k, 0)),   # wh tile (streamed)
            pl.BlockSpec((1, Hd_p), lambda i, k: (0, 0)),    # bh
            pl.BlockSpec((Hd_p, Nh), lambda i, k: (0, 0)),   # fused head W
            pl.BlockSpec((1, Nh), lambda i, k: (0, 0)),      # fused head b
        ]
        out_specs = (
            pl.BlockSpec((bm, Nh), lambda i, k: (i, 0)),
            pl.BlockSpec((bm, Hd_p), lambda i, k: (i, 0)),
        )
        dims = ("parallel", "arbitrary")
        wh_reads = n_btiles               # wh re-streamed once per batch tile

    cost = pl.CostEstimate(
        flops=2 * Bp * Fp * Hd_p + 2 * Bp * Hd_p * Nh,
        transcendentals=0,
        bytes_accessed=(Bp * Fp * xbytes + wh_reads * wh_bytes
                        + Hd_p * Nh * 2 + (Hd_p + Nh) * 4 + out_bytes),
    )

    heads_out, hidden_out = pl.pallas_call(
        kernel,
        out_shape=out_shapes,
        grid_spec=pltpu.PrefetchScalarGridSpec(
            num_scalar_prefetch=0,
            grid=grid,
            in_specs=in_specs,
            out_specs=out_specs,
        ),
        compiler_params=pltpu.CompilerParams(dimension_semantics=dims),
        cost_estimate=cost,
    )(x_in, packed["wh"], packed["bh"], packed["w_heads"], packed["b_heads"])

    logits = heads_out[:B, :C]
    self_pred = heads_out[:B, C_pad:C_pad + Hd]
    hidden = hidden_out[:B, :Hd]
    return logits, self_pred, hidden


# ---------------------------------------------------------------------------
# PyTorch-Linear-style init (weights stored [in, out])
# ---------------------------------------------------------------------------
def init_params(key, input_size, hidden_size, num_classes):
    k = jax.random.split(key, 6)

    def linear(kw, kb, fan_in, fan_out):
        bound = 1.0 / math.sqrt(fan_in)
        w = jax.random.uniform(kw, (fan_in, fan_out), jnp.float32, -bound, bound)
        b = jax.random.uniform(kb, (1, fan_out), jnp.float32, -bound, bound)
        return w, b

    wh, bh = linear(k[0], k[1], input_size, hidden_size)
    wo, bo = linear(k[2], k[3], hidden_size, num_classes)
    ws, bs = linear(k[4], k[5], hidden_size, hidden_size)
    return {"wh": wh, "bh": bh, "wo": wo, "bo": bo, "ws": ws, "bs": bs}


if __name__ == "__main__":
    # Small shapes consistent with the module: batch=2, C=4, H=W=16
    # -> input_size = 4*16*16 = 1024, hidden_size = 128, num_classes = 10
    B, Cc, H, W = 2, 4, 16, 16
    input_size = Cc * H * W
    hidden_size = 128
    num_classes = 10

    key = jax.random.PRNGKey(0)
    kx, kp = jax.random.split(key)
    x = jax.random.normal(kx, (B, Cc, H, W), jnp.float32)
    params = init_params(kp, input_size, hidden_size, num_classes)

    packed = prepare_packed_params(params)          # one-time weight packing
    logits, self_pred, hidden = jax.block_until_ready(
        self_modeling_mlp_forward(x, packed))

    # sanity-check against a pure-JAX reference that uses the same bf16
    # quantization of inputs / weights / hidden as the kernel.
    bf = lambda a: a.astype(jnp.bfloat16).astype(jnp.float32)
    hp = jax.lax.Precision.HIGHEST
    xf = x.reshape(B, -1)
    h_ref = jnp.maximum(
        jnp.dot(bf(xf), bf(params["wh"]), precision=hp) + params["bh"], 0.0)
    h_q = bf(h_ref)
    logits_ref = jnp.dot(h_q, bf(params["wo"]), precision=hp) + params["bo"]
    sp_ref = jnp.dot(h_q, bf(params["ws"]), precision=hp) + params["bs"]

    assert hidden.shape == (B, hidden_size)
    assert logits.shape == (B, num_classes)
    assert self_pred.shape == (B, hidden_size)
    assert jnp.allclose(hidden, h_ref, atol=1e-2, rtol=1e-2)
    assert jnp.allclose(logits, logits_ref, atol=1e-2, rtol=1e-2)
    assert jnp.allclose(self_pred, sp_ref, atol=1e-2, rtol=1e-2)

    print("KERNEL_OK")
</pallas_src>

<mosaic_0001>
module attributes {stable_mosaic.version = 11 : i64} {
  func.func @_mlp_kernel_resident(%arg0: i32, %arg1: memref<8x1024xf32, #tpu.memory_space<vmem>>, %arg2: memref<1024x128xbf16, #tpu.memory_space<vmem>>, %arg3: memref<1x128xf32, #tpu.memory_space<vmem>>, %arg4: memref<128x256xbf16, #tpu.memory_space<vmem>>, %arg5: memref<1x256xf32, #tpu.memory_space<vmem>>, %arg6: memref<8x256xf32, #tpu.memory_space<vmem>>, %arg7: memref<8x128xf32, #tpu.memory_space<vmem>>) attributes {dimension_semantics = [#tpu.dimension_semantics<parallel>], iteration_bounds = array<i64: 1>, scalar_prefetch = 0 : i64, scratch_operands = 0 : i64, tpu.core_type = #tpu.core_type<tc>, window_params = [{transform_indices = @transform_0, window_bounds = array<i64: 8, 1024>}, {pipeline_mode = #tpu.pipeline_mode<synchronous>, transform_indices = @transform_1, window_bounds = array<i64: 1024, 128>}, {pipeline_mode = #tpu.pipeline_mode<synchronous>, transform_indices = @transform_2, window_bounds = array<i64: 1, 128>}, {pipeline_mode = #tpu.pipeline_mode<synchronous>, transform_indices = @transform_3, window_bounds = array<i64: 128, 256>}, {pipeline_mode = #tpu.pipeline_mode<synchronous>, transform_indices = @transform_4, window_bounds = array<i64: 1, 256>}, {transform_indices = @transform_5, window_bounds = array<i64: 8, 256>}, {transform_indices = @transform_6, window_bounds = array<i64: 8, 128>}]} {
    %c0 = arith.constant 0 : index
    %c0_0 = arith.constant 0 : index
    %0 = vector.load %arg1[%c0, %c0_0] : memref<8x1024xf32, #tpu.memory_space<vmem>>, vector<8x1024xf32>
    %1 = arith.truncf %0 : vector<8x1024xf32> to vector<8x1024xbf16>
    %c0_1 = arith.constant 0 : index
    %c0_2 = arith.constant 0 : index
    %2 = vector.load %arg2[%c0_1, %c0_2] : memref<1024x128xbf16, #tpu.memory_space<vmem>>, vector<1024x128xbf16>
    %cst = arith.constant dense<0.000000e+00> : vector<8x128xf32>
    %3 = tpu.matmul %1, %2, %cst {dimension_numbers = #tpu.dot_dimension_numbers<[1], [0], [0], [1], [0, 0, 1, 1], [], []>} : vector<8x1024xbf16>, vector<1024x128xbf16>, vector<8x128xf32> -> vector<8x128xf32>
    %c0_3 = arith.constant 0 : index
    %c0_4 = arith.constant 0 : index
    %4 = vector.load %arg3[%c0_3, %c0_4] : memref<1x128xf32, #tpu.memory_space<vmem>>, vector<1x128xf32>
    %5 = vector.broadcast %4 : vector<1x128xf32> to vector<8x128xf32>
    %6 = arith.addf %3, %5 : vector<8x128xf32>
    %cst_5 = arith.constant 0.000000e+00 : f32
    %7 = vector.broadcast %cst_5 : f32 to vector<8x128xf32>
    %8 = arith.maximumf %6, %7 : vector<8x128xf32>
    %c0_6 = arith.constant 0 : index
    %c0_7 = arith.constant 0 : index
    %9 = vector.load %arg7[%c0_6, %c0_7] : memref<8x128xf32, #tpu.memory_space<vmem>>, vector<8x128xf32>
    tpu.vector_store %arg7[%c0_6, %c0_7], %8 {strides = array<i32>} : memref<8x128xf32, #tpu.memory_space<vmem>>, vector<8x128xf32>,
    %10 = arith.truncf %8 : vector<8x128xf32> to vector<8x128xbf16>
    %c0_8 = arith.constant 0 : index
    %c0_9 = arith.constant 0 : index
    %11 = vector.load %arg4[%c0_8, %c0_9] : memref<128x256xbf16, #tpu.memory_space<vmem>>, vector<128x256xbf16>
    %cst_10 = arith.constant dense<0.000000e+00> : vector<8x256xf32>
    %12 = tpu.matmul %10, %11, %cst_10 {dimension_numbers = #tpu.dot_dimension_numbers<[1], [0], [0], [1], [0, 0, 1, 1], [], []>} : vector<8x128xbf16>, vector<128x256xbf16>, vector<8x256xf32> -> vector<8x256xf32>
    %c0_11 = arith.constant 0 : index
    %c0_12 = arith.constant 0 : index
    %13 = vector.load %arg5[%c0_11, %c0_12] : memref<1x256xf32, #tpu.memory_space<vmem>>, vector<1x256xf32>
    %14 = vector.broadcast %13 : vector<1x256xf32> to vector<8x256xf32>
    %15 = arith.addf %12, %14 : vector<8x256xf32>
    %c0_13 = arith.constant 0 : index
    %c0_14 = arith.constant 0 : index
    %16 = vector.load %arg6[%c0_13, %c0_14] : memref<8x256xf32, #tpu.memory_space<vmem>>, vector<8x256xf32>
    tpu.vector_store %arg6[%c0_13, %c0_14], %15 {strides = array<i32>} : memref<8x256xf32, #tpu.memory_space<vmem>>, vector<8x256xf32>,
    return
  }
  func.func @transform_0(%arg0: i32) -> (i32, i32) {
    %c0_i32 = arith.constant 0 : i32
    %c0_i32_0 = arith.constant 0 : i32
    return %arg0, %c0_i32 : i32, i32
  }
  func.func @transform_1(%arg0: i32) -> (i32, i32) {
    %c0_i32 = arith.constant 0 : i32
    %c0_i32_0 = arith.constant 0 : i32
    %c0_i32_1 = arith.constant 0 : i32
    return %c0_i32, %c0_i32_0 : i32, i32
  }
  func.func @transform_2(%arg0: i32) -> (i32, i32) {
    %c0_i32 = arith.constant 0 : i32
    %c0_i32_0 = arith.constant 0 : i32
    %c0_i32_1 = arith.constant 0 : i32
    return %c0_i32, %c0_i32_0 : i32, i32
  }
  func.func @transform_3(%arg0: i32) -> (i32, i32) {
    %c0_i32 = arith.constant 0 : i32
    %c0_i32_0 = arith.constant 0 : i32
    %c0_i32_1 = arith.constant 0 : i32
    return %c0_i32, %c0_i32_0 : i32, i32
  }
  func.func @transform_4(%arg0: i32) -> (i32, i32) {
    %c0_i32 = arith.constant 0 : i32
    %c0_i32_0 = arith.constant 0 : i32
    %c0_i32_1 = arith.constant 0 : i32
    return %c0_i32, %c0_i32_0 : i32, i32
  }
  func.func @transform_5(%arg0: i32) -> (i32, i32) {
    %c0_i32 = arith.constant 0 : i32
    %c0_i32_0 = arith.constant 0 : i32
    return %arg0, %c0_i32 : i32, i32
  }
  func.func @transform_6(%arg0: i32) -> (i32, i32) {
    %c0_i32 = arith.constant 0 : i32
    %c0_i32_0 = arith.constant 0 : i32
    return %arg0, %c0_i32 : i32, i32
  }
}

</mosaic_0001>

<bundles_post_ra>
// kernel: tpu_custom_call.1
= control target key start
LH: loop header
LB: loop body
LE: loop exit
PB: predicated region body
PF: predicated region fallthrough
CT: control target
= control target key end

     0   :  { %12 = vsyncpa [#allocation3], 0  ;;  %s1439_s0 = inlined_call_operand.hbm [shape: f32[8,1024], index: 0, kind: input, shape index: {}]   ;;  %s1440_s1 = inlined_call_operand.hbm [shape: bf16[1024,128], index: 1, kind: input, shape index: {}]   ;;  %s1441_s2 = inlined_call_operand.vmem [shape: f32[1,128], index: 2, kind: input, shape index: {}]   ;;  %s1442_s3 = inlined_call_operand.hbm [shape: bf16[128,256], index: 3, kind: input, shape index: {}]   ;;  %s1443_s4 = inlined_call_operand.vmem [shape: f32[1,256], index: 4, kind: input, shape index: {}]   ;;  %s1444_s5 = inlined_call_operand.hbm [shape: f32[8,256], index: 5, kind: output, shape index: {0}]   ;;  %s1445_s6 = inlined_call_operand.hbm [shape: f32[8,128], index: 6, kind: output, shape index: {1}]  }
   0x1   :  { %13 = vsyncpa [#allocation6], 0 }
   0x2   :  { %14 = vsyncpa [#allocation4], 0 }
   0x3   :  { %15 = vsyncpa [#allocation10], 0  ;;  %s1328_s21 = smov [#allocation5]   ;;  %s1210_s25 = scalar_lea.hbm %s1440_s1, 8192 }
   0x4   :  { %s31_s22 = sshll.u32 %s1328_s21, 4  ;;  %p1211_p0 = scmp.ne.s32.totalorder %s1440_s1, %s1210_s25  ;;  %s32_s22 = int_to_ptr.vmem [resolvable:$true] %s31_s22 }
   0x5   :  { %p1214_p1 = scmp.lt.u32.totalorder %s1210_s25, %s1440_s1 }
   0x7   :  { %p1216_p2 = pnand %p1214_p1, %p1211_p0 }
   0x9   :  { %1219 = shalt.err (!%p1216_p2)
}
   0xa   :  { %s1220_s30 = scalar_lea.vmem %s32_s22, 8192  ;;  %p1225_p4 = scmp.lt.s32.totalorder %s32_s22, %s32_s22 }
   0xb   :  { %p1221_p3 = scmp.ne.s32.totalorder %s32_s22, %s1220_s30  ;;  %p1226_p5 = scmp.lt.s32.totalorder %s1220_s30, %s1220_s30 }
   0xd   :  { %p1227_p6 = por %p1226_p5, %p1225_p4 }
   0xf   :  { %p1228_p7 = pnand %p1227_p6, %p1221_p3 }
  0x11   :  { %1231 = shalt.err (!%p1228_p7)
}
  0x12   :  { %s1329_s7 = smov 64   ;;  %s1330_s8 = smov 4  }
  0x13   :  { %37 = dma.hbm_to_vmem [thread:$0]  %s1440_s1, 8192, %s32_s22, [#allocation6], %s1329_s7, %s1329_s7, %s1330_s8  }
  0x14   :  { %s1331_s11 = smov [#allocation2]   ;;  %s1332_s13 = smov [#allocation7]  }
  0x15   :  { %s22_s12 = sshll.u32 %s1331_s11, 4  ;;  %s45_s14 = sshll.u32 %s1332_s13, 4  ;;  %s23_s12 = int_to_ptr.vmem [resolvable:$true] %s22_s12  ;;  %s46_s14 = int_to_ptr.vmem [resolvable:$true] %s45_s14 }
  0x16   :  { %s1232_s17 = scalar_lea.hbm %s1439_s0, 1024 }
  0x17   :  { %p1233_p8 = scmp.ne.s32.totalorder %s1439_s0, %s1232_s17  ;;  %p1236_p9 = scmp.lt.u32.totalorder %s1232_s17, %s1439_s0 }
  0x19   :  { %p1238_p10 = pnand %p1236_p9, %p1233_p8 }
  0x1b   :  { %1241 = shalt.err (!%p1238_p10)
}
  0x1c   :  { %s1242_s1 = scalar_lea.vmem %s23_s12, 1024  ;;  %p1247_p12 = scmp.lt.s32.totalorder %s23_s12, %s23_s12 }
  0x1d   :  { %p1243_p11 = scmp.ne.s32.totalorder %s23_s12, %s1242_s1  ;;  %p1248_p13 = scmp.lt.s32.totalorder %s1242_s1, %s1242_s1 }
  0x1f   :  { %p1249_p0 = por %p1248_p13, %p1247_p12 }
  0x21   :  { %p1250_p1 = pnand %p1249_p0, %p1243_p11 }
  0x23   :  { %1253 = shalt.err (!%p1250_p1)
}
  0x24   :  { %25 = dma.hbm_to_vmem [thread:$0]  %s1439_s0, 1024, %s23_s12, [#allocation3]  }
  0x25   :  { %s1254_s26 = scalar_lea.hbm %s1442_s3, 2048 }
  0x26   :  { %p1255_p2 = scmp.ne.s32.totalorder %s1442_s3, %s1254_s26  ;;  %p1258_p3 = scmp.lt.u32.totalorder %s1254_s26, %s1442_s3 }
  0x28   :  { %p1260_p4 = pnand %p1258_p3, %p1255_p2 }
  0x2a   :  { %1263 = shalt.err (!%p1260_p4)
}
  0x2b   :  { %s1264_s7 = scalar_lea.vmem %s46_s14, 2048  ;;  %p1269_p6 = scmp.lt.s32.totalorder %s46_s14, %s46_s14 }
  0x2c   :  { %p1265_p5 = scmp.ne.s32.totalorder %s46_s14, %s1264_s7  ;;  %p1270_p7 = scmp.lt.s32.totalorder %s1264_s7, %s1264_s7 }
  0x2e   :  { %p1271_p8 = por %p1270_p7, %p1269_p6 }
  0x30   :  { %p1272_p9 = pnand %p1271_p8, %p1265_p5 }
  0x32   :  { %1275 = shalt.err (!%p1272_p9)
}
  0x33   :  { %s1333_s0 = smov 128   ;;  %s1334_s8 = smov 8  }
  0x34   :  { %51 = dma.hbm_to_vmem [thread:$0]  %s1442_s3, 2048, %s46_s14, [#allocation6], %s1333_s0, %s1333_s0, %s1334_s8  }
  0x35   :  { %1320 = dma.done.wait [#allocation3], 1024  }
  0x36   :  { %1321 = vsyncadd [#allocation3], 4294966272 }
  0x37   :  { %1322 = dma.done.wait [#allocation6], 10240  }
  0x38   :  { %1323 = vsyncadd [#allocation6], 4294957056  ;;  %v1122_v0 = vld [vmem:[#allocation5 + $0x40] sm:$0xff]   ;;  %v1126_v4 = vld [vmem:[#allocation5 + $0x48] sm:$0xff]  }
  0x39   :  { %v1123_v1 = vld [vmem:[#allocation5 + $0xc0] sm:$0xff]   ;;  %1024 = vmatprep.subr.bf16.mxu0 %v1122_v0  ;;  %v1127_v5 = vld [vmem:[#allocation5 + $0xc8] sm:$0xff]   ;;  %v1130_v8 = vld [vmem:[#allocation5 + $0x50] sm:$0xff]  }
  0x3a   :  { %v1124_v2 = vld [vmem:[#allocation5] sm:$0xff]   ;;  %1046 = vmatprep.subr.bf16.mxu1 %v1123_v1  ;;  %v1128_v6 = vld [vmem:[#allocation5 + $0x8] sm:$0xff]   ;;  %v1131_v9 = vld [vmem:[#allocation5 + $0xd0] sm:$0xff]  }
  0x3b   :  { %v1125_v3 = vld [vmem:[#allocation5 + $0x80] sm:$0xff]   ;;  %1025 = vmatpush3.bf16.msra.mxu0 %v1124_v2  ;;  %v1129_v7 = vld [vmem:[#allocation5 + $0x88] sm:$0xff]   ;;  %v1132_v10 = vld [vmem:[#allocation5 + $0x10] sm:$0xff]  }
  0x3c   :  { %1047 = vmatpush3.bf16.msra.mxu1 %v1125_v3  ;;  %1026 = vmatprep.subr.bf16.mxu0 %v1126_v4  ;;  %v1133_v11 = vld [vmem:[#allocation5 + $0x90] sm:$0xff]   ;;  %v1134_v12 = vld [vmem:[#allocation5 + $0x58] sm:$0xff]   ;;  %v1138_v16 = vld [vmem:[#allocation5 + $0x60] sm:$0xff]  }
  0x3d   :  { %1048 = vmatprep.subr.bf16.mxu1 %v1127_v5  ;;  %v1135_v13 = vld [vmem:[#allocation5 + $0xd8] sm:$0xff]   ;;  %v1139_v17 = vld [vmem:[#allocation5 + $0xe0] sm:$0xff]   ;;  %v1142_v20 = vld [vmem:[#allocation5 + $0x68] sm:$0xff]  }
  0x3e   :  { %v1136_v14 = vld [vmem:[#allocation5 + $0x18] sm:$0xff]   ;;  %v1140_v18 = vld [vmem:[#allocation5 + $0x20] sm:$0xff]   ;;  %v1143_v21 = vld [vmem:[#allocation5 + $0xe8] sm:$0xff]  }
  0x3f   :  { %1027 = vmatpush3.bf16.msra.mxu0 %v1128_v6  ;;  %v1137_v15 = vld [vmem:[#allocation5 + $0x98] sm:$0xff]   ;;  %v1141_v19 = vld [vmem:[#allocation5 + $0xa0] sm:$0xff]   ;;  %v1144_v22 = vld [vmem:[#allocation5 + $0x28] sm:$0xff]  }
  0x40   :  { %1049 = vmatpush3.bf16.msra.mxu1 %v1129_v7  ;;  %1028 = vmatprep.subr.bf16.mxu0 %v1130_v8  ;;  %v1145_v23 = vld [vmem:[#allocation5 + $0xa8] sm:$0xff]   ;;  %v1146_v24 = vld [vmem:[#allocation5 + $0x70] sm:$0xff]   ;;  %v1150_v28 = vld [vmem:[#allocation5 + $0x78] sm:$0xff]  }
  0x41   :  { %1050 = vmatprep.subr.bf16.mxu1 %v1131_v9  ;;  %v1147_v25 = vld [vmem:[#allocation5 + $0xf0] sm:$0xff]   ;;  %v1151_v29 = vld [vmem:[#allocation5 + $0xf8] sm:$0xff]   ;;  %v65_v32 = vld [vmem:[#allocation2 + $0x8] sm:$0xff] }
  0x42   :  { %v1148_v26 = vld [vmem:[#allocation5 + $0x30] sm:$0xff]   ;;  %v1152_v30 = vld [vmem:[#allocation5 + $0x38] sm:$0xff]   ;;  %v64_v34 = vld [vmem:[#allocation2] sm:$0xff]  ;;  %v73_v35 = vpack.c.bf16 %v65_v32, %v65_v32  ;;  %v1335_v32 = vmov 0  }
  0x43   :  { %1029 = vmatpush3.bf16.msra.mxu0 %v1132_v10  ;;  %v1149_v27 = vld [vmem:[#allocation5 + $0xb0] sm:$0xff]   ;;  %v1153_v31 = vld [vmem:[#allocation5 + $0xb8] sm:$0xff]   ;;  %v72_v37 = vpack.c.bf16 %v64_v34, %v64_v34  ;;  %v1154_v40 = vld [vmem:[#allocation5 + $0x140] sm:$0xff]  }
  0x44   :  { %1051 = vmatpush3.bf16.msra.mxu1 %v1133_v11  ;;  %1030 = vmatprep.subr.bf16.mxu0 %v1134_v12  ;;  %v67_v33 = vld [vmem:[#allocation2 + $0x18] sm:$0xff]  ;;  %v66_v38 = vld [vmem:[#allocation2 + $0x10] sm:$0xff]  ;;  %v1155_v41 = vld [vmem:[#allocation5 + $0x1c0] sm:$0xff]  }
  0x45   :  { %1052 = vmatprep.subr.bf16.mxu1 %v1135_v13  ;;  %v75_v36 = vpack.c.bf16 %v67_v33, %v67_v33  ;;  %v74_v39 = vpack.c.bf16 %v66_v38, %v66_v38  ;;  %631 = vmatprep.mubr.bf16.mxu0 %v73_v35  ;;  %v1156_v42 = vld [vmem:[#allocation5 + $0x100] sm:$0xff]   ;;  %v1158_v44 = vld [vmem:[#allocation5 + $0x148] sm:$0xff]   ;;  %v1162_v48 = vld [vmem:[#allocation5 + $0x150] sm:$0xff]  }
  0x46   :  { %v1157_v43 = vld [vmem:[#allocation5 + $0x180] sm:$0xff]   ;;  %v1159_v45 = vld [vmem:[#allocation5 + $0x1c8] sm:$0xff]   ;;  %v1163_v49 = vld [vmem:[#allocation5 + $0x1d0] sm:$0xff]  }
  0x47   :  { %1031 = vmatpush3.bf16.msra.mxu0 %v1136_v14  ;;  %671 = vmatprep.mubr.bf16.mxu1 %v75_v36  ;;  %v1160_v46 = vld [vmem:[#allocation5 + $0x108] sm:$0xff]   ;;  %v1164_v50 = vld [vmem:[#allocation5 + $0x110] sm:$0xff]   ;;  %v1166_v52 = vld [vmem:[#allocation5 + $0x158] sm:$0xff]  }
  0x48   :  { %1053 = vmatpush3.bf16.msra.mxu1 %v1137_v15  ;;  %1032 = vmatprep.subr.bf16.mxu0 %v1138_v16  ;;  %v1161_v47 = vld [vmem:[#allocation5 + $0x188] sm:$0xff]   ;;  %v1165_v51 = vld [vmem:[#allocation5 + $0x190] sm:$0xff]   ;;  %v1167_v53 = vld [vmem:[#allocation5 + $0x1d8] sm:$0xff]  }
  0x49   :  { %1054 = vmatprep.subr.bf16.mxu1 %v1139_v17  ;;  %v1168_v54 = vld [vmem:[#allocation5 + $0x118] sm:$0xff]   ;;  %v1170_v56 = vld [vmem:[#allocation5 + $0x160] sm:$0xff]   ;;  %v1174_v60 = vld [vmem:[#allocation5 + $0x168] sm:$0xff]  }
  0x4a   :  { %v1169_v55 = vld [vmem:[#allocation5 + $0x198] sm:$0xff]   ;;  %v1171_v57 = vld [vmem:[#allocation5 + $0x1e0] sm:$0xff]   ;;  %v1175_v61 = vld [vmem:[#allocation5 + $0x1e8] sm:$0xff]  }
  0x4b   :  { %1033 = vmatpush3.bf16.msra.mxu0 %v1140_v18  ;;  %v1172_v58 = vld [vmem:[#allocation5 + $0x120] sm:$0xff]   ;;  %v1176_v62 = vld [vmem:[#allocation5 + $0x128] sm:$0xff]   ;;  %v1178_v0 = vld [vmem:[#allocation5 + $0x170] sm:$0xff]  }
  0x4c   :  { %1055 = vmatpush3.bf16.msra.mxu1 %v1141_v19  ;;  %1034 = vmatprep.subr.bf16.mxu0 %v1142_v20  ;;  %v1173_v59 = vld [vmem:[#allocation5 + $0x1a0] sm:$0xff]   ;;  %v1177_v63 = vld [vmem:[#allocation5 + $0x1a8] sm:$0xff]   ;;  %v1179_v1 = vld [vmem:[#allocation5 + $0x1f0] sm:$0xff]  }
  0x4d   :  { %1056 = vmatprep.subr.bf16.mxu1 %v1143_v21  ;;  %v1180_v2 = vld [vmem:[#allocation5 + $0x130] sm:$0xff]   ;;  %v1182_v4 = vld [vmem:[#allocation5 + $0x178] sm:$0xff]   ;;  %v69_v8 = vld [vmem:[#allocation2 + $0x28] sm:$0xff] }
  0x4e   :  { %v1181_v3 = vld [vmem:[#allocation5 + $0x1b0] sm:$0xff]   ;;  %v1183_v5 = vld [vmem:[#allocation5 + $0x1f8] sm:$0xff]   ;;  %v77_v10 = vpack.c.bf16 %v69_v8, %v69_v8  ;;  %v68_v12 = vld [vmem:[#allocation2 + $0x20] sm:$0xff] }
  0x4f   :  { %1035 = vmatpush3.bf16.msra.mxu0 %v1144_v22  ;;  %v1184_v6 = vld [vmem:[#allocation5 + $0x138] sm:$0xff]   ;;  %v70_v13 = vld [vmem:[#allocation2 + $0x30] sm:$0xff]  ;;  %v76_v14 = vpack.c.bf16 %v68_v12, %v68_v12  ;;  %v1186_v16 = vld [vmem:[#allocation7] ss:$8 sps:$4 sm:$0xff]  }
  0x50   :  { %1057 = vmatpush3.bf16.msra.mxu1 %v1145_v23  ;;  %1036 = vmatprep.subr.bf16.mxu0 %v1146_v24  ;;  %v1185_v7 = vld [vmem:[#allocation5 + $0x1b8] sm:$0xff]   ;;  %v78_v15 = vpack.c.bf16 %v70_v13, %v70_v13  ;;  %v1188_v17 = vld [vmem:[#allocation7 + $0x4] ss:$8 sps:$4 sm:$0xff]   ;;  %v1192_v21 = vld [vmem:[#allocation7 + $0x20] ss:$8 sps:$4 sm:$0xff]  }
  0x51   :  { %1058 = vmatprep.subr.bf16.mxu1 %v1147_v25  ;;  %v71_v9 = vld [vmem:[#allocation2 + $0x38] sm:$0xff]  ;;  %v1194_v20 = vld [vmem:[#allocation7 + $0x24] ss:$8 sps:$4 sm:$0xff]   ;;  %v1198_v25 = vld [vmem:[#allocation7 + $0x40] ss:$8 sps:$4 sm:$0xff]  }
  0x52   :  { %v79_v11 = vpack.c.bf16 %v71_v9, %v71_v9  ;;  %v1191_v18 = vld [vmem:[#allocation7 + $0x14] ss:$8 sps:$4 sm:$0xff]   ;;  %v1189_v19 = vld [vmem:[#allocation7 + $0x10] ss:$8 sps:$4 sm:$0xff]   ;;  %v1200_v24 = vld [vmem:[#allocation7 + $0x44] ss:$8 sps:$4 sm:$0xff]  }
  0x53   :  { %1037 = vmatpush3.bf16.msra.mxu0 %v1148_v26  ;;  %v1197_v22 = vld [vmem:[#allocation7 + $0x34] ss:$8 sps:$4 sm:$0xff]   ;;  %v1195_v23 = vld [vmem:[#allocation7 + $0x30] ss:$8 sps:$4 sm:$0xff]   ;;  %v943_v35 = vld [vmem:[%s1441_s2] ss:$0 sm:$0xff] }
  0x54   :  { %1059 = vmatpush3.bf16.msra.mxu1 %v1149_v27  ;;  %1038 = vmatprep.subr.bf16.mxu0 %v1150_v28  ;;  %v1203_v26 = vld [vmem:[#allocation7 + $0x54] ss:$8 sps:$4 sm:$0xff]   ;;  %v1201_v27 = vld [vmem:[#allocation7 + $0x50] ss:$8 sps:$4 sm:$0xff]   ;;  %v1206_v28 = vld [vmem:[#allocation7 + $0x64] ss:$8 sps:$4 sm:$0xff]  }
  0x55   :  { %1060 = vmatprep.subr.bf16.mxu1 %v1151_v29  ;;  %v1204_v29 = vld [vmem:[#allocation7 + $0x60] ss:$8 sps:$4 sm:$0xff]   ;;  %s1336_s2 = smov [#allocation9]  }
  0x56   :  { %s929_s12 = sshll.u32 %s1336_s2, 4  ;;  %s930_s12 = int_to_ptr.vmem [resolvable:$true] %s929_s12 }
  0x57   :  { %1039 = vmatpush3.bf16.msra.mxu0 %v1152_v30  ;;  %v1209_v30 = vld [vmem:[#allocation7 + $0x74] ss:$8 sps:$4 sm:$0xff]   ;;  %s1276_s13 = scalar_lea.vmem %s930_s12, 128  ;;  %p1281_p11 = scmp.lt.s32.totalorder %s930_s12, %s930_s12 }
  0x58   :  { %1061 = vmatpush3.bf16.msra.mxu1 %v1153_v31  ;;  %1068 = vmatprep.subr.bf16.mxu0 %v1154_v40  ;;  %v1207_v31 = vld [vmem:[#allocation7 + $0x70] ss:$8 sps:$4 sm:$0xff]   ;;  %p1277_p10 = scmp.ne.s32.totalorder %s930_s12, %s1276_s13  ;;  %p1282_p12 = scmp.lt.s32.totalorder %s1276_s13, %s1276_s13 }
  0x59   :  { %1090 = vmatprep.subr.bf16.mxu1 %v1155_v41 }
  0x5a   :  { %632 = vmatmul.mubr.bf16.vlgmr.msra.gmra.mrb[0].mxu0 %v72_v37  ;;  %p1283_p13 = por %p1282_p12, %p1281_p11 }
  0x5b   :  { %672 = vmatmul.mubr.bf16.vlgmr.msra.gmra.mrb[0].mxu1 %v74_v39  ;;  %1069 = vmatpush3.bf16.msra.mxu0 %v1156_v42 }
  0x5c   :  { %1091 = vmatpush3.bf16.msra.mxu1 %v1157_v43  ;;  %1070 = vmatprep.subr.bf16.mxu0 %v1158_v44  ;;  %p1284_p0 = pnand %p1283_p13, %p1277_p10 }
  0x5d   :  { %1092 = vmatprep.subr.bf16.mxu1 %v1159_v45  ;;  %711 = vmatprep.mubr.bf16.mxu0 %v77_v10 }
  0x5e   :  { %751 = vmatprep.mubr.bf16.mxu1 %v79_v11 }
  0x5f   :  { %1071 = vmatpush3.bf16.msra.mxu0 %v1160_v46 }
  0x60   :  { %1093 = vmatpush3.bf16.msra.mxu1 %v1161_v47  ;;  %1072 = vmatprep.subr.bf16.mxu0 %v1162_v48 }
  0x61   :  { %1094 = vmatprep.subr.bf16.mxu1 %v1163_v49 }
  0x63   :  { %1073 = vmatpush3.bf16.msra.mxu0 %v1164_v50 }
  0x64   :  { %1095 = vmatpush3.bf16.msra.mxu1 %v1165_v51  ;;  %1074 = vmatprep.subr.bf16.mxu0 %v1166_v52 }
  0x65   :  { %1096 = vmatprep.subr.bf16.mxu1 %v1167_v53 }
  0x67   :  { %1075 = vmatpush3.bf16.msra.mxu0 %v1168_v54 }
  0x68   :  { %1097 = vmatpush3.bf16.msra.mxu1 %v1169_v55  ;;  %1076 = vmatprep.subr.bf16.mxu0 %v1170_v56 }
  0x69   :  { %1098 = vmatprep.subr.bf16.mxu1 %v1171_v57 }
  0x6b   :  { %1077 = vmatpush3.bf16.msra.mxu0 %v1172_v58 }
  0x6c   :  { %1099 = vmatpush3.bf16.msra.mxu1 %v1173_v59  ;;  %1078 = vmatprep.subr.bf16.mxu0 %v1174_v60 }
  0x6d   :  { %1100 = vmatprep.subr.bf16.mxu1 %v1175_v61 }
  0x6f   :  { %1079 = vmatpush3.bf16.msra.mxu0 %v1176_v62 }
  0x70   :  { %1101 = vmatpush3.bf16.msra.mxu1 %v1177_v63  ;;  %1080 = vmatprep.subr.bf16.mxu0 %v1178_v0 }
  0x71   :  { %1102 = vmatprep.subr.bf16.mxu1 %v1179_v1 }
  0x73   :  { %1081 = vmatpush3.bf16.msra.mxu0 %v1180_v2 }
  0x74   :  { %1103 = vmatpush3.bf16.msra.mxu1 %v1181_v3  ;;  %1082 = vmatprep.subr.bf16.mxu0 %v1182_v4 }
  0x75   :  { %1104 = vmatprep.subr.bf16.mxu1 %v1183_v5 }
  0x77   :  { %1083 = vmatpush3.bf16.msra.mxu0 %v1184_v6 }
  0x78   :  { %1105 = vmatpush3.bf16.msra.mxu1 %v1185_v7  ;;  %870 = vmatprep.subr.bf16.mxu0 %v1188_v17 }
  0x7a   :  { %712 = vmatmul.mubr.bf16.vlgmr.msra.gmra.mrb[4].mxu0 %v76_v14 }
  0x7b   :  { %752 = vmatmul.mubr.bf16.vlgmr.msra.gmra.mrb[4].mxu1 %v78_v15  ;;  %871 = vmatpush1.bf16.msra.mxu0 %v1186_v16 }
  0x7c   :  { %872 = vmatprep.subr.bf16.mxu0 %v1191_v18  ;;  %902 = vmatprep.mubr.bf16.mxu0 %v1335_v32 }
  0x7f   :  { %873 = vmatpush1.bf16.msra.mxu0 %v1189_v19 }
  0x80   :  { %874 = vmatprep.subr.bf16.mxu0 %v1194_v20 }
  0x83   :  { %875 = vmatpush1.bf16.msra.mxu0 %v1192_v21 }
  0x84   :  { %876 = vmatprep.subr.bf16.mxu0 %v1197_v22 }
  0x87   :  { %877 = vmatpush1.bf16.msra.mxu0 %v1195_v23 }
  0x88   :  { %878 = vmatprep.subr.bf16.mxu0 %v1200_v24 }
  0x8b   :  { %879 = vmatpush1.bf16.msra.mxu0 %v1198_v25 }
  0x8c   :  { %880 = vmatprep.subr.bf16.mxu0 %v1203_v26 }
  0x8f   :  { %881 = vmatpush1.bf16.msra.mxu0 %v1201_v27 }
  0x90   :  { %882 = vmatprep.subr.bf16.mxu0 %v1206_v28 }
  0x93   :  { %883 = vmatpush1.bf16.msra.mxu0 %v1204_v29 }
  0x94   :  { %884 = vmatprep.subr.bf16.mxu0 %v1209_v30 }
  0x97   :  { %885 = vmatpush1.bf16.msra.mxu0 %v1207_v31 }
 0x12d   :  { %v1040_v33 = vpop.f32.mrb[0].mxu0 }
 0x12e   :  { %v1062_v34 = vpop.f32.mrb[0].mxu1  ;;  %v1041_v36 = vpop.f32.mrb[1].mxu0 }
 0x12f   :  { %v1063_v37 = vpop.f32.mrb[1].mxu1  ;;  %v1042_v38 = vadd.f32 %v1041_v36, %v1040_v33  ;;  %v1043_v40 = vpop.f32.mrb[2].mxu0 }
 0x130   :  { %v1064_v39 = vadd.f32 %v1063_v37, %v1062_v34  ;;  %v1065_v41 = vpop.f32.mrb[2].mxu1  ;;  %v1044_v42 = vpop.f32.mrb[3].mxu0 }
 0x131   :  { %v1066_v43 = vpop.f32.mrb[3].mxu1  ;;  %v634_v44 = vadd.f32 %v1042_v38, %v943_v35 }
 0x133   :  { %v674_v45 = vadd.f32 %v1064_v39, %v634_v44 }
 0x14d   :  { %v1084_v46 = vpop.f32.mrb[4].mxu0 }
 0x14e   :  { %v1106_v47 = vpop.f32.mrb[4].mxu1  ;;  %v1085_v48 = vpop.f32.mrb[5].mxu0 }
 0x14f   :  { %v1086_v49 = vadd.f32 %v1085_v48, %v1084_v46  ;;  %v1107_v50 = vpop.f32.mrb[5].mxu1  ;;  %v1087_v51 = vpop.f32.mrb[6].mxu0 }
 0x150   :  { %v1108_v52 = vadd.f32 %v1107_v50, %v1106_v47  ;;  %v1109_v53 = vpop.f32.mrb[6].mxu1  ;;  %v1088_v54 = vpop.f32.mrb[7].mxu0 }
 0x151   :  { %v714_v55 = vadd.f32 %v1086_v49, %v674_v45  ;;  %v1110_v56 = vpop.f32.mrb[7].mxu1 }
 0x153   :  { %v754_v57 = vadd.f32 %v1108_v52, %v714_v55 }
 0x155   :  { %v759_v58 = vmax.f32 %v754_v57, 0.0 }
 0x157   :  { %v761_v59 = vpack.c.bf16 %v759_v58, %v759_v58  ;;  %760 = vst [vmem:[#allocation9] sm:$0xff] %v759_v58 }
 0x159   :  { %903 = vmatmul.mubr.bf16.vlgmr.msra.gmra.mrb[8].mxu0 %v761_v59 }
 0x15a   :  { %1287 = shalt.err (!%p1284_p0)
}
 0x15b   :  { %s1288_s16 = scalar_lea.hbm %s1445_s6, 128 }
 0x15c   :  { %p1289_p1 = scmp.ne.s32.totalorder %s1445_s6, %s1288_s16  ;;  %p1292_p2 = scmp.lt.u32.totalorder %s1288_s16, %s1445_s6 }
 0x15e   :  { %p1294_p3 = pnand %p1292_p2, %p1289_p1 }
 0x160   :  { %1297 = shalt.err (!%p1294_p3)
}
 0x161   :  { %932 = dma.vmem_to_hbm [thread:$0]  %s930_s12, 128, %s1445_s6, [#allocation10]   ;;  %v780_v60 = vlaneseq  ;;  %v778_v63 = vld [vmem:[%s1443_s4] sm:$0x3] }
 0x162   :  { %s1337_s24 = smov [#allocation8]  }
 0x163   :  { %v781_v61 = vshrl.u32 %v780_v60, 7  ;;  %s919_s25 = sshll.u32 %s1337_s24, 4  ;;  %s920_s25 = int_to_ptr.vmem [resolvable:$true] %s919_s25 }
 0x164   :  { %s1298_s6 = scalar_lea.vmem %s920_s25, 256  ;;  %p1303_p5 = scmp.lt.s32.totalorder %s920_s25, %s920_s25 }
 0x165   :  { %v782_v62 = vsub.s32 0, %v781_v61  ;;  %v786_v0 = vsub.s32 1, %v781_v61  ;;  %p1299_p4 = scmp.ne.s32.totalorder %s920_s25, %s1298_s6  ;;  %p1304_p6 = scmp.lt.s32.totalorder %s1298_s6, %s1298_s6 }
 0x167   :  { %v783_v1 = vrot.slane %v778_v63, %v782_v62  ;;  %v787_v2 = vrot.slane %v778_v63, %v786_v0  ;;  %p1305_p7 = por %p1304_p6, %p1303_p5 }
 0x169   :  { %p1306_p8 = pnand %p1305_p7, %p1299_p4 }
 0x22c   :  { %v904_v3 = vpop.f32.mrb[8].mxu0 }
 0x22d   :  { %v905_v4 = vadd.f32 %v904_v3, %v783_v1  ;;  %v906_v5 = vpop.f32.mrb[9].mxu0 }
 0x22e   :  { %v907_v6 = vadd.f32 %v906_v5, %v787_v2  ;;  %v908_v7 = vpop.f32.mrb[10].mxu0 }
 0x22f   :  { %911 = vst [vmem:[#allocation8] sm:$0xff] %v905_v4  ;;  %v909_v8 = vpop.f32.mrb[11].mxu0 }
 0x230   :  { %912 = vst [vmem:[#allocation8 + $0x8] sm:$0xff] %v907_v6 }
 0x231   :  { %1309 = shalt.err (!%p1306_p8)
}
 0x232   :  { %s1310_s27 = scalar_lea.hbm %s1444_s5, 256 }
 0x233   :  { %p1311_p9 = scmp.ne.s32.totalorder %s1444_s5, %s1310_s27  ;;  %p1314_p10 = scmp.lt.u32.totalorder %s1310_s27, %s1444_s5 }
 0x235   :  { %p1316_p11 = pnand %p1314_p10, %p1311_p9 }
 0x237   :  { %1319 = shalt.err (!%p1316_p11)
}
 0x238   :  { %922 = dma.vmem_to_hbm [thread:$0]  %s920_s25, 256, %s1444_s5, [#allocation4]  }
 0x239   :  { %1324 = dma.done.wait [#allocation4], 256  }
 0x23a   :  { %1325 = vsyncadd [#allocation4], 4294967040 }
 0x23b   :  { %1326 = dma.done.wait [#allocation10], 128  }
 0x23c   :  { %1327 = vsyncadd [#allocation10], 4294967168 }
 0x23d   :  { %939 = vsyncpa [#allocation3], 1 }
 0x23e   :  { %940 = vsyncpa [#allocation6], 1 }
 0x23f   :  { %941 = vsyncpa [#allocation4], 1 }
 0x240   :  { %942 = vsyncpa [#allocation10], 1 }

</bundles_post_ra>
